<compile_context>
chip_gen: v5e
topology: v5e:2x2
jax: 0.10.0
libtpu: 0.0.40
codegen_flags: <defaults>
</compile_context>

<pallas_src>
import functools

import jax
import jax.numpy as jnp
from jax.experimental import pallas as pl
from jax.experimental.pallas import tpu as pltpu

F0_THRESHOLD = 0.5
LO_THRESHOLD = 0.5
EPS = 1e-6

_ROW_TILE_CAP = 4096          # max rows per grid step (sublane axis)


def _round_up(x, m):
    return (x + m - 1) // m * m


def _tpu_config():
    """Returns (vmem_capacity_bytes, tensorcores_per_chip) with safe fallbacks."""
    vmem_cap = 0
    cores = 0
    try:
        info = pltpu.get_tpu_info()
        vmem_cap = int(getattr(info, "vmem_capacity_bytes", 0) or 0)
        for name in ("num_tensorcores", "tensorcores_per_chip", "num_cores",
                     "core_count", "tensor_cores_per_chip"):
            val = getattr(info, name, None)
            if isinstance(val, int) and val > 0:
                cores = val
                break
    except Exception:
        pass
    kind = ""
    try:
        kind = str(jax.devices()[0].device_kind).lower()
    except Exception:
        pass
    if vmem_cap <= 0:
        big_vmem = any(g in kind for g in ("v2", "v3", "v4", "v5", "v6"))
        vmem_cap = (128 << 20) if big_vmem else (64 << 20)   # v7x/unknown -> 64 MiB
    if cores <= 0:
        cores = 2 if any(g in kind for g in ("7", "v4", "v5p")) else 1
    return vmem_cap, cores


def _midi_loss_kernel(gen_f0_ref, t_f0_ref, gen_lo_ref, t_lo_ref, mask_ref,
                      out_ref, acc_f0_ref, acc_lo_ref, *, inv_t, total_rows):
    """Accumulate per-row relu(|mean diff| - thr) for f0 and lo.

    Grid = (cores, row_tiles).  acc_*_ref are (tr, 1) f32 VMEM accumulators,
    re-initialised at row_tile == 0 and reduced + flushed to this core's
    (1, 8, 128) output block at its last row tile.  Rows beyond `total_rows`
    (ragged last tile / clamped out-of-range tiles) are masked to zero.
    """
    c = pl.program_id(0)
    i = pl.program_id(1)
    nt = pl.num_programs(1)

    @pl.when(i == 0)
    def _init():
        acc_f0_ref[...] = jnp.zeros_like(acc_f0_ref)
        acc_lo_ref[...] = jnp.zeros_like(acc_lo_ref)

    tr = mask_ref.shape[0]

    # Row-validity mask: Pallas does not zero partial / out-of-range block
    # contents, so invalid rows must be dropped explicitly (jnp.where also
    # kills any NaN/Inf garbage that would survive a multiply-by-zero).
    row_id = jax.lax.broadcasted_iota(jnp.int32, (tr, 1), 0)
    rows_valid = total_rows - (c * nt + i) * tr
    valid = row_id < rows_valid

    # Shared per-row denominator: mean(mask) + eps.  Cast to f32 in-kernel so
    # bf16 inputs still reduce at full precision.
    mask = mask_ref[...].astype(jnp.float32)
    denom = jnp.sum(mask, axis=-1, keepdims=True) * inv_t + EPS   # (tr, 1)

    def _per_row(gen_ref, tgt_ref, threshold):
        # Fused: |mean(mask*gen) - mean(mask*tgt)| == |mean(mask*(gen-tgt))|
        # because both share the same denominator.
        d = gen_ref[...].astype(jnp.float32) - tgt_ref[...].astype(jnp.float32)
        s = jnp.sum(mask * d, axis=-1, keepdims=True) * inv_t     # (tr, 1)
        pr = jnp.maximum(jnp.abs(s) / denom - threshold, 0.0)
        return jnp.where(valid, pr, 0.0)

    acc_f0_ref[...] += _per_row(gen_f0_ref, t_f0_ref, F0_THRESHOLD)
    acc_lo_ref[...] += _per_row(gen_lo_ref, t_lo_ref, LO_THRESHOLD)

    @pl.when(i == nt - 1)
    def _finalize():
        s_f0 = jnp.sum(acc_f0_ref[...])
        s_lo = jnp.sum(acc_lo_ref[...])
        sub = jax.lax.broadcasted_iota(jnp.int32, out_ref.shape, 1)
        lane = jax.lax.broadcasted_iota(jnp.int32, out_ref.shape, 2)
        out_ref[...] = jnp.where((sub == 0) & (lane == 0), s_f0,
                                 jnp.where((sub == 0) & (lane == 1), s_lo, 0.0))


def midi_loss(gen_f0, t_f0, gen_lo, t_lo, mask, *, row_tile=None,
              core_split=None):
    """Returns (loss_pitch, loss_lo) as float32 scalars.

    All inputs share shape (B, N, T).  `row_tile` / `core_split` are optional
    overrides (used by the tests); by default they are sized from the chip's
    VMEM capacity and TensorCore count."""
    B, N, T = mask.shape
    R = B * N

    itemsize = max(jnp.dtype(x.dtype).itemsize
                   for x in (gen_f0, t_f0, gen_lo, t_lo, mask))
    t_pad = _round_up(T, 128)             # lane padding counts against VMEM

    vmem_cap, detected_cores = _tpu_config()
    if vmem_cap <= (64 << 20):            # v7x: 64 MiB VMEM per TensorCore
        input_budget, limit_cap = 44 << 20, 56 << 20
    else:                                 # v5e / v6e / v5p: 128 MiB
        input_budget, limit_cap = 96 << 20, 112 << 20

    # Per-row VMEM footprint: 5 inputs x 2 pipeline buffers (lane padded) plus
    # two (tr, 1) f32 accumulators (lane padded to 128).
    per_row_bytes = 10 * t_pad * itemsize + 2 * 128 * 4

    if row_tile is not None:
        tr = max(8, _round_up(int(row_tile), 8))
    else:
        budget_tr = max(8, (input_budget // per_row_bytes) // 8 * 8)
        tr = max(8, min(_ROW_TILE_CAP, budget_tr, _round_up(R, 8)))

    num_tiles = pl.cdiv(R, tr)
    n_cores = int(core_split) if core_split is not None else int(detected_cores)
    n_cores = max(1, min(n_cores, num_tiles))
    nt = pl.cdiv(num_tiles, n_cores)

    def flat(x):
        # No padding: the ragged last tile is masked inside the kernel.
        return x.reshape(R, T)

    last_tile = num_tiles - 1
    # Clamp so the 2nd core's shard never requests a fully out-of-bounds block
    # when num_tiles is odd; the kernel's row-validity mask zeroes its
    # contribution anyway.
    in_spec = pl.BlockSpec(
        (tr, T), lambda c, i: (jnp.minimum(c * nt + i, last_tile), 0))
    out_spec = pl.BlockSpec((1, 8, 128), lambda c, i: (c, 0, 0))

    usage = tr * per_row_bytes + 2 * 8 * 128 * 4
    vmem_limit = int(min(limit_cap, max(usage + (4 << 20), 16 << 20)))

    kernel = functools.partial(_midi_loss_kernel, inv_t=1.0 / T, total_rows=R)

    out = pl.pallas_call(
        kernel,
        out_shape=jax.ShapeDtypeStruct((n_cores, 8, 128), jnp.float32),
        grid_spec=pltpu.PrefetchScalarGridSpec(
            num_scalar_prefetch=0,
            grid=(n_cores, nt),
            in_specs=[in_spec] * 5,
            out_specs=out_spec,
            scratch_shapes=[pltpu.VMEM((tr, 1), jnp.float32),
                            pltpu.VMEM((tr, 1), jnp.float32)],
        ),
        compiler_params=pltpu.CompilerParams(
            dimension_semantics=("parallel", "arbitrary"),
            vmem_limit_bytes=vmem_limit,
        ),
    )(flat(gen_f0), flat(t_f0), flat(gen_lo), flat(t_lo), flat(mask))

    # Combine per-core partial sums; divide by the TRUE row count R.
    sums = jnp.sum(out[:, 0, 0:2], axis=0)
    loss_pitch = sums[0] / R
    loss_lo = sums[1] / R
    return loss_pitch * (1.0 + loss_pitch), loss_lo * (1.0 + loss_lo)


def _reference(gen_f0, t_f0, gen_lo, t_lo, mask):
    # Pure-JAX port of the PyTorch forward, for verification.
    def contour_loss(mk_gen, mk_tgt, mask, thr):
        mean_gen = jnp.mean(mk_gen, axis=-1) / (jnp.mean(mask, axis=-1) + EPS)
        mean_tgt = jnp.mean(mk_tgt, axis=-1) / (jnp.mean(mask, axis=-1) + EPS)
        diff = jnp.abs(mean_gen - mean_tgt)
        loss = jnp.mean(jax.nn.relu(diff - thr))
        return loss * (1 + loss)

    lp = contour_loss(mask * gen_f0, mask * t_f0, mask, F0_THRESHOLD)
    ll = contour_loss(mask * gen_lo, mask * t_lo, mask, LO_THRESHOLD)
    return lp, ll


def _run_case(key, B, N, T, **kwargs):
    k1, k2, k3, k4, k5 = jax.random.split(key, 5)
    gen_f0 = jax.random.uniform(k1, (B, N, T), jnp.float32) * 12.0
    t_f0 = jax.random.uniform(k2, (B, N, T), jnp.float32) * 12.0
    gen_lo = jax.random.uniform(k3, (B, N, T), jnp.float32)
    t_lo = jax.random.uniform(k4, (B, N, T), jnp.float32)
    mask = (jax.random.uniform(k5, (B, N, T), jnp.float32) > 0.5).astype(jnp.float32)

    loss_pitch, loss_lo = midi_loss(gen_f0, t_f0, gen_lo, t_lo, mask, **kwargs)
    jax.block_until_ready((loss_pitch, loss_lo))

    ref_pitch, ref_lo = _reference(gen_f0, t_f0, gen_lo, t_lo, mask)
    assert jnp.allclose(loss_pitch, ref_pitch, atol=1e-5, rtol=1e-4), (
        loss_pitch, ref_pitch)
    assert jnp.allclose(loss_lo, ref_lo, atol=1e-5, rtol=1e-4), (loss_lo, ref_lo)


if __name__ == "__main__":
    key = jax.random.PRNGKey(0)
    k_a, k_b = jax.random.split(key)

    # Small case: single tile, auto-sized tile / core split.
    _run_case(k_a, B=2, N=8, T=128)
    # Larger case: forces small row tiles and a 2-way core split so the
    # un-padded ragged last tile, the clamped out-of-range shard iteration,
    # and the in-kernel row-validity masking are all exercised
    # (R = 310 rows, tr = 64 -> 5 tiles, T = 192 not a multiple of 128).
    _run_case(k_b, B=2, N=155, T=192, row_tile=64, core_split=2)

    print("KERNEL_OK")
</pallas_src>

<mosaic_0001>
module attributes {stable_mosaic.version = 11 : i64} {
  func.func @_midi_loss_kernel(%arg0: i32, %arg1: i32, %arg2: memref<16x128xf32, #tpu.memory_space<vmem>>, %arg3: memref<16x128xf32, #tpu.memory_space<vmem>>, %arg4: memref<16x128xf32, #tpu.memory_space<vmem>>, %arg5: memref<16x128xf32, #tpu.memory_space<vmem>>, %arg6: memref<16x128xf32, #tpu.memory_space<vmem>>, %arg7: memref<1x8x128xf32, #tpu.memory_space<vmem>>, %arg8: memref<16x1xf32, #tpu.memory_space<vmem>>, %arg9: memref<16x1xf32, #tpu.memory_space<vmem>>) attributes {dimension_semantics = [#tpu.dimension_semantics<parallel>, #tpu.dimension_semantics<arbitrary>], iteration_bounds = array<i64: 1, 1>, scalar_prefetch = 0 : i64, scratch_operands = 2 : i64, tpu.core_type = #tpu.core_type<tc>, window_params = [{transform_indices = @transform_0, window_bounds = array<i64: 16, 128>}, {transform_indices = @transform_1, window_bounds = array<i64: 16, 128>}, {transform_indices = @transform_2, window_bounds = array<i64: 16, 128>}, {transform_indices = @transform_3, window_bounds = array<i64: 16, 128>}, {transform_indices = @transform_4, window_bounds = array<i64: 16, 128>}, {transform_indices = @transform_5, window_bounds = array<i64: 1, 8, 128>}]} {
    %c0_i32 = arith.constant 0 : i32
    %0 = arith.cmpi eq, %arg1, %c0_i32 : i32
    %1 = arith.extui %0 : i1 to i32
    %c0_i32_0 = arith.constant 0 : i32
    %2 = arith.cmpi ne, %1, %c0_i32_0 : i32
    scf.if %2 {
      %cst_33 = arith.constant 0.000000e+00 : f32
      %58 = vector.broadcast %cst_33 : f32 to vector<16x1xf32>
      %c0_34 = arith.constant 0 : index
      %c0_35 = arith.constant 0 : index
      %59 = vector.load %arg8[%c0_34, %c0_35] : memref<16x1xf32, #tpu.memory_space<vmem>>, vector<16x1xf32>
      tpu.vector_store %arg8[%c0_34, %c0_35], %58 {strides = array<i32>} : memref<16x1xf32, #tpu.memory_space<vmem>>, vector<16x1xf32>,
      %cst_36 = arith.constant 0.000000e+00 : f32
      %60 = vector.broadcast %cst_36 : f32 to vector<16x1xf32>
      %c0_37 = arith.constant 0 : index
      %c0_38 = arith.constant 0 : index
      %61 = vector.load %arg9[%c0_37, %c0_38] : memref<16x1xf32, #tpu.memory_space<vmem>>, vector<16x1xf32>
      tpu.vector_store %arg9[%c0_37, %c0_38], %60 {strides = array<i32>} : memref<16x1xf32, #tpu.memory_space<vmem>>, vector<16x1xf32>,
    } else {
    }
    %3 = tpu.iota {dimensions = array<i32: 0>} : vector<16x1xi32>
    %c1_i32 = arith.constant 1 : i32
    %4 = arith.muli %arg0, %c1_i32 : i32
    %5 = arith.addi %4, %arg1 : i32
    %c16_i32 = arith.constant 16 : i32
    %6 = arith.muli %5, %c16_i32 : i32
    %c16_i32_1 = arith.constant 16 : i32
    %7 = arith.subi %c16_i32_1, %6 : i32
    %8 = vector.broadcast %7 : i32 to vector<16x1xi32>
    %9 = arith.cmpi slt, %3, %8 : vector<16x1xi32>
    %c0 = arith.constant 0 : index
    %c0_2 = arith.constant 0 : index
    %10 = vector.load %arg6[%c0, %c0_2] : memref<16x128xf32, #tpu.memory_space<vmem>>, vector<16x128xf32>
    %cst = arith.constant dense<0.000000e+00> : vector<16xf32>
    %11 = vector.multi_reduction <add>, %10, %cst [1] : vector<16x128xf32> to vector<16xf32>
    %12 = vector.shape_cast %11 : vector<16xf32> to vector<16x1xf32>
    %cst_3 = arith.constant 7.812500e-03 : f32
    %13 = vector.broadcast %cst_3 : f32 to vector<16x1xf32>
    %14 = arith.mulf %12, %13 : vector<16x1xf32>
    %cst_4 = arith.constant 9.99999997E-7 : f32
    %15 = vector.broadcast %cst_4 : f32 to vector<16x1xf32>
    %16 = arith.addf %14, %15 : vector<16x1xf32>
    %c0_5 = arith.constant 0 : index
    %c0_6 = arith.constant 0 : index
    %17 = vector.load %arg8[%c0_5, %c0_6] : memref<16x1xf32, #tpu.memory_space<vmem>>, vector<16x1xf32>
    %c0_7 = arith.constant 0 : index
    %c0_8 = arith.constant 0 : index
    %18 = vector.load %arg2[%c0_7, %c0_8] : memref<16x128xf32, #tpu.memory_space<vmem>>, vector<16x128xf32>
    %c0_9 = arith.constant 0 : index
    %c0_10 = arith.constant 0 : index
    %19 = vector.load %arg3[%c0_9, %c0_10] : memref<16x128xf32, #tpu.memory_space<vmem>>, vector<16x128xf32>
    %20 = arith.subf %18, %19 : vector<16x128xf32>
    %21 = arith.mulf %10, %20 : vector<16x128xf32>
    %cst_11 = arith.constant dense<0.000000e+00> : vector<16xf32>
    %22 = vector.multi_reduction <add>, %21, %cst_11 [1] : vector<16x128xf32> to vector<16xf32>
    %23 = vector.shape_cast %22 : vector<16xf32> to vector<16x1xf32>
    %cst_12 = arith.constant 7.812500e-03 : f32
    %24 = vector.broadcast %cst_12 : f32 to vector<16x1xf32>
    %25 = arith.mulf %23, %24 : vector<16x1xf32>
    %26 = math.absf %25 : vector<16x1xf32>
    %27 = arith.divf %26, %16 : vector<16x1xf32>
    %cst_13 = arith.constant 5.000000e-01 : f32
    %28 = vector.broadcast %cst_13 : f32 to vector<16x1xf32>
    %29 = arith.subf %27, %28 : vector<16x1xf32>
    %cst_14 = arith.constant 0.000000e+00 : f32
    %30 = vector.broadcast %cst_14 : f32 to vector<16x1xf32>
    %31 = arith.maximumf %29, %30 : vector<16x1xf32>
    %cst_15 = arith.constant 0.000000e+00 : f32
    %32 = vector.broadcast %cst_15 : f32 to vector<16x1xf32>
    %33 = arith.select %9, %31, %32 : vector<16x1xi1>, vector<16x1xf32>
    %34 = arith.addf %17, %33 : vector<16x1xf32>
    %c0_16 = arith.constant 0 : index
    %c0_17 = arith.constant 0 : index
    %35 = vector.load %arg8[%c0_16, %c0_17] : memref<16x1xf32, #tpu.memory_space<vmem>>, vector<16x1xf32>
    tpu.vector_store %arg8[%c0_16, %c0_17], %34 {strides = array<i32>} : memref<16x1xf32, #tpu.memory_space<vmem>>, vector<16x1xf32>,
    %c0_18 = arith.constant 0 : index
    %c0_19 = arith.constant 0 : index
    %36 = vector.load %arg9[%c0_18, %c0_19] : memref<16x1xf32, #tpu.memory_space<vmem>>, vector<16x1xf32>
    %c0_20 = arith.constant 0 : index
    %c0_21 = arith.constant 0 : index
    %37 = vector.load %arg4[%c0_20, %c0_21] : memref<16x128xf32, #tpu.memory_space<vmem>>, vector<16x128xf32>
    %c0_22 = arith.constant 0 : index
    %c0_23 = arith.constant 0 : index
    %38 = vector.load %arg5[%c0_22, %c0_23] : memref<16x128xf32, #tpu.memory_space<vmem>>, vector<16x128xf32>
    %39 = arith.subf %37, %38 : vector<16x128xf32>
    %40 = arith.mulf %10, %39 : vector<16x128xf32>
    %cst_24 = arith.constant dense<0.000000e+00> : vector<16xf32>
    %41 = vector.multi_reduction <add>, %40, %cst_24 [1] : vector<16x128xf32> to vector<16xf32>
    %42 = vector.shape_cast %41 : vector<16xf32> to vector<16x1xf32>
    %cst_25 = arith.constant 7.812500e-03 : f32
    %43 = vector.broadcast %cst_25 : f32 to vector<16x1xf32>
    %44 = arith.mulf %42, %43 : vector<16x1xf32>
    %45 = math.absf %44 : vector<16x1xf32>
    %46 = arith.divf %45, %16 : vector<16x1xf32>
    %cst_26 = arith.constant 5.000000e-01 : f32
    %47 = vector.broadcast %cst_26 : f32 to vector<16x1xf32>
    %48 = arith.subf %46, %47 : vector<16x1xf32>
    %cst_27 = arith.constant 0.000000e+00 : f32
    %49 = vector.broadcast %cst_27 : f32 to vector<16x1xf32>
    %50 = arith.maximumf %48, %49 : vector<16x1xf32>
    %cst_28 = arith.constant 0.000000e+00 : f32
    %51 = vector.broadcast %cst_28 : f32 to vector<16x1xf32>
    %52 = arith.select %9, %50, %51 : vector<16x1xi1>, vector<16x1xf32>
    %53 = arith.addf %36, %52 : vector<16x1xf32>
    %c0_29 = arith.constant 0 : index
    %c0_30 = arith.constant 0 : index
    %54 = vector.load %arg9[%c0_29, %c0_30] : memref<16x1xf32, #tpu.memory_space<vmem>>, vector<16x1xf32>
    tpu.vector_store %arg9[%c0_29, %c0_30], %53 {strides = array<i32>} : memref<16x1xf32, #tpu.memory_space<vmem>>, vector<16x1xf32>,
    %c0_i32_31 = arith.constant 0 : i32
    %55 = arith.cmpi eq, %arg1, %c0_i32_31 : i32
    %56 = arith.extui %55 : i1 to i32
    %c0_i32_32 = arith.constant 0 : i32
    %57 = arith.cmpi ne, %56, %c0_i32_32 : i32
    scf.if %57 {
      %c0_33 = arith.constant 0 : index
      %c0_34 = arith.constant 0 : index
      %58 = vector.load %arg8[%c0_33, %c0_34] : memref<16x1xf32, #tpu.memory_space<vmem>>, vector<16x1xf32>
      %59 = vector.shape_cast %58 : vector<16x1xf32> to vector<1x16x1xf32>
      %cst_35 = arith.constant dense<0.000000e+00> : vector<1xf32>
      %60 = vector.multi_reduction <add>, %59, %cst_35 [1, 2] : vector<1x16x1xf32> to vector<1xf32>
      %61 = vector.shape_cast %60 : vector<1xf32> to vector<1x1x1xf32>
      %62 = vector.extract %61[0, 0, 0] : f32 from vector<1x1x1xf32>
      %c0_36 = arith.constant 0 : index
      %c0_37 = arith.constant 0 : index
      %63 = vector.load %arg9[%c0_36, %c0_37] : memref<16x1xf32, #tpu.memory_space<vmem>>, vector<16x1xf32>
      %64 = vector.shape_cast %63 : vector<16x1xf32> to vector<1x16x1xf32>
      %cst_38 = arith.constant dense<0.000000e+00> : vector<1xf32>
      %65 = vector.multi_reduction <add>, %64, %cst_38 [1, 2] : vector<1x16x1xf32> to vector<1xf32>
      %66 = vector.shape_cast %65 : vector<1xf32> to vector<1x1x1xf32>
      %67 = vector.extract %66[0, 0, 0] : f32 from vector<1x1x1xf32>
      %68 = tpu.iota {dimensions = array<i32: 1>} : vector<1x8x128xi32>
      %69 = tpu.iota {dimensions = array<i32: 2>} : vector<1x8x128xi32>
      %c0_i32_39 = arith.constant 0 : i32
      %70 = vector.broadcast %c0_i32_39 : i32 to vector<1x8x128xi32>
      %71 = arith.cmpi eq, %68, %70 : vector<1x8x128xi32>
      %c0_i32_40 = arith.constant 0 : i32
      %72 = vector.broadcast %c0_i32_40 : i32 to vector<1x8x128xi32>
      %73 = arith.cmpi eq, %69, %72 : vector<1x8x128xi32>
      %74 = arith.andi %71, %73 : vector<1x8x128xi1>
      %c0_i32_41 = arith.constant 0 : i32
      %75 = vector.broadcast %c0_i32_41 : i32 to vector<1x8x128xi32>
      %76 = arith.cmpi eq, %68, %75 : vector<1x8x128xi32>
      %c1_i32_42 = arith.constant 1 : i32
      %77 = vector.broadcast %c1_i32_42 : i32 to vector<1x8x128xi32>
      %78 = arith.cmpi eq, %69, %77 : vector<1x8x128xi32>
      %79 = arith.andi %76, %78 : vector<1x8x128xi1>
      %cst_43 = arith.constant 0.000000e+00 : f32
      %80 = vector.broadcast %67 : f32 to vector<1x8x128xf32>
      %81 = vector.broadcast %cst_43 : f32 to vector<1x8x128xf32>
      %82 = arith.select %79, %80, %81 : vector<1x8x128xi1>, vector<1x8x128xf32>
      %83 = vector.broadcast %62 : f32 to vector<1x8x128xf32>
      %84 = arith.select %74, %83, %82 : vector<1x8x128xi1>, vector<1x8x128xf32>
      %c0_44 = arith.constant 0 : index
      %c0_45 = arith.constant 0 : index
      %c0_46 = arith.constant 0 : index
      %85 = vector.load %arg7[%c0_44, %c0_45, %c0_46] : memref<1x8x128xf32, #tpu.memory_space<vmem>>, vector<1x8x128xf32>
      tpu.vector_store %arg7[%c0_44, %c0_45, %c0_46], %84 {strides = array<i32>} : memref<1x8x128xf32, #tpu.memory_space<vmem>>, vector<1x8x128xf32>,
    } else {
    }
    return
  }
  func.func @transform_0(%arg0: i32, %arg1: i32) -> (i32, i32) {
    %c1_i32 = arith.constant 1 : i32
    %0 = arith.muli %arg0, %c1_i32 : i32
    %1 = arith.addi %0, %arg1 : i32
    %c0_i32 = arith.constant 0 : i32
    %2 = arith.minsi %1, %c0_i32 : i32
    %c0_i32_0 = arith.constant 0 : i32
    %c0_i32_1 = arith.constant 0 : i32
    return %2, %c0_i32_0 : i32, i32
  }
  func.func @transform_1(%arg0: i32, %arg1: i32) -> (i32, i32) {
    %c1_i32 = arith.constant 1 : i32
    %0 = arith.muli %arg0, %c1_i32 : i32
    %1 = arith.addi %0, %arg1 : i32
    %c0_i32 = arith.constant 0 : i32
    %2 = arith.minsi %1, %c0_i32 : i32
    %c0_i32_0 = arith.constant 0 : i32
    %c0_i32_1 = arith.constant 0 : i32
    return %2, %c0_i32_0 : i32, i32
  }
  func.func @transform_2(%arg0: i32, %arg1: i32) -> (i32, i32) {
    %c1_i32 = arith.constant 1 : i32
    %0 = arith.muli %arg0, %c1_i32 : i32
    %1 = arith.addi %0, %arg1 : i32
    %c0_i32 = arith.constant 0 : i32
    %2 = arith.minsi %1, %c0_i32 : i32
    %c0_i32_0 = arith.constant 0 : i32
    %c0_i32_1 = arith.constant 0 : i32
    return %2, %c0_i32_0 : i32, i32
  }
  func.func @transform_3(%arg0: i32, %arg1: i32) -> (i32, i32) {
    %c1_i32 = arith.constant 1 : i32
    %0 = arith.muli %arg0, %c1_i32 : i32
    %1 = arith.addi %0, %arg1 : i32
    %c0_i32 = arith.constant 0 : i32
    %2 = arith.minsi %1, %c0_i32 : i32
    %c0_i32_0 = arith.constant 0 : i32
    %c0_i32_1 = arith.constant 0 : i32
    return %2, %c0_i32_0 : i32, i32
  }
  func.func @transform_4(%arg0: i32, %arg1: i32) -> (i32, i32) {
    %c1_i32 = arith.constant 1 : i32
    %0 = arith.muli %arg0, %c1_i32 : i32
    %1 = arith.addi %0, %arg1 : i32
    %c0_i32 = arith.constant 0 : i32
    %2 = arith.minsi %1, %c0_i32 : i32
    %c0_i32_0 = arith.constant 0 : i32
    %c0_i32_1 = arith.constant 0 : i32
    return %2, %c0_i32_0 : i32, i32
  }
  func.func @transform_5(%arg0: i32, %arg1: i32) -> (i32, i32, i32) {
    %c0_i32 = arith.constant 0 : i32
    %c0_i32_0 = arith.constant 0 : i32
    %c0_i32_1 = arith.constant 0 : i32
    return %arg0, %c0_i32, %c0_i32_0 : i32, i32, i32
  }
}

</mosaic_0001>

<bundles_post_ra>
// kernel: tpu_custom_call.1
= control target key start
LH: loop header
LB: loop body
LE: loop exit
PB: predicated region body
PF: predicated region fallthrough
CT: control target
= control target key end

     0   :  { %10 = vsyncpa [#allocation5], 0  ;;  %s580_s0 = inlined_call_operand.hbm [shape: f32[16,128], index: 0, kind: input, shape index: {}]   ;;  %s581_s1 = inlined_call_operand.hbm [shape: f32[16,128], index: 1, kind: input, shape index: {}]   ;;  %s582_s2 = inlined_call_operand.hbm [shape: f32[16,128], index: 2, kind: input, shape index: {}]   ;;  %s583_s3 = inlined_call_operand.hbm [shape: f32[16,128], index: 3, kind: input, shape index: {}]   ;;  %s584_s4 = inlined_call_operand.hbm [shape: f32[16,128], index: 4, kind: input, shape index: {}]   ;;  %s585_s5 = inlined_call_operand.hbm [shape: f32[1,8,128], index: 5, kind: output, shape index: {}]  }
   0x1   :  { %11 = vsyncpa [#allocation8], 0 }
   0x2   :  { %12 = vsyncpa [#allocation11], 0 }
   0x3   :  { %13 = vsyncpa [#allocation6], 0  ;;  %s43_s20 = sshll.u32 %s581_s1, 4  ;;  %s511_s21 = smov [#allocation7]   ;;  %s44_s20 = int_to_ptr.hbm [resolvable:$true] %s43_s20 }
   0x4   :  { %s45_s22 = sshll.u32 %s511_s21, 4  ;;  %s81_s25 = sshll.u32 %s583_s3, 4  ;;  %s46_s22 = int_to_ptr.vmem [resolvable:$true] %s45_s22  ;;  %s82_s25 = int_to_ptr.hbm [resolvable:$true] %s81_s25 }
   0x5   :  { %s512_s26 = smov 128   ;;  %s513_s27 = smov 8  }
   0x6   :  { %51 = dma.hbm_to_vmem [thread:$0]  %s44_s20, 256, %s46_s22, [#allocation8], %s512_s26, %s512_s26, %s513_s27  }
   0x7   :  { %s514_s28 = smov [#allocation10]   ;;  %s24_s7 = sshll.u32 %s580_s0, 4  ;;  %s25_s7 = int_to_ptr.hbm [resolvable:$true] %s24_s7 }
   0x8   :  { %s83_s29 = sshll.u32 %s514_s28, 4  ;;  %s62_s9 = sshll.u32 %s582_s2, 4  ;;  %s84_s29 = int_to_ptr.vmem [resolvable:$true] %s83_s29  ;;  %s63_s9 = int_to_ptr.hbm [resolvable:$true] %s62_s9 }
   0x9   :  { %89 = dma.hbm_to_vmem [thread:$0]  %s82_s25, 256, %s84_s29, [#allocation11], %s512_s26, %s512_s26, %s513_s27  }
   0xa   :  { %s515_s10 = smov [#allocation4]   ;;  %s516_s3 = smov [#allocation9]  }
   0xb   :  { %s26_s11 = sshll.u32 %s515_s10, 4  ;;  %s64_s12 = sshll.u32 %s516_s3, 4  ;;  %s27_s11 = int_to_ptr.vmem [resolvable:$true] %s26_s11  ;;  %s65_s12 = int_to_ptr.vmem [resolvable:$true] %s64_s12 }
   0xc   :  { %32 = dma.hbm_to_vmem [thread:$0]  %s25_s7, 256, %s27_s11, [#allocation5], %s512_s26, %s512_s26, %s513_s27  }
   0xd   :  { %s100_s15 = sshll.u32 %s584_s4, 4  ;;  %s517_s0 = smov [#allocation12]   ;;  %s101_s15 = int_to_ptr.hbm [resolvable:$true] %s100_s15 }
   0xe   :  { %70 = dma.hbm_to_vmem [thread:$0]  %s63_s9, 256, %s65_s12, [#allocation8], %s512_s26, %s512_s26, %s513_s27  }
   0xf   :  { %s102_s16 = sshll.u32 %s517_s0, 4  ;;  %s103_s16 = int_to_ptr.vmem [resolvable:$true] %s102_s16 }
  0x10   :  { %108 = dma.hbm_to_vmem [thread:$0]  %s101_s15, 256, %s103_s16, [#allocation11], %s512_s26, %s512_s26, %s513_s27  }
  0x11   :  { %503 = dma.done.wait [#allocation5], 256  }
  0x12   :  { %504 = vsyncadd [#allocation5], 4294967040 }
  0x13   :  { %505 = dma.done.wait [#allocation8], 512  }
  0x14   :  { %506 = vsyncadd [#allocation8], 4294966784 }
  0x15   :  { %507 = dma.done.wait [#allocation11], 512  }
  0x16   :  { %508 = vsyncadd [#allocation11], 4294966784  ;;  %v167_v0 = vld [vmem:[#allocation12] sm:$0xff]  ;;  %v240_v2 = vld [vmem:[#allocation10] sm:$0xff]  ;;  %vm153_vm0 = vcmask 7168   ;;  %v518_v18 = vmov 0.0  }
  0x17   :  { %v238_v1 = vld [vmem:[#allocation9] sm:$0xff]  ;;  %169 = vadd.xlane.f32.xlu0 %v167_v0  ;;  %v181_v4 = vld [vmem:[#allocation7] sm:$0xff]  ;;  %v239_v7 = vld [vmem:[#allocation9 + $0x8] sm:$0xff]  ;;  %156 = vst.msk [vmem:[#allocation3] sm:$0xff] %vm153_vm0, %v518_v18  ;;  %s519_s2 = smov [#allocation13]   ;;  %s316_s20 = sshll.u32 %s585_s5, 4  ;;  %s317_s20 = int_to_ptr.hbm [resolvable:$true] %s316_s20 }
  0x18   :  { %v179_v3 = vld [vmem:[#allocation4] sm:$0xff]  ;;  %v242_v5 = vsub.f32 %v238_v1, %v240_v2  ;;  %v241_v8 = vld [vmem:[#allocation10 + $0x8] sm:$0xff]  ;;  %v180_v9 = vld [vmem:[#allocation4 + $0x8] sm:$0xff]  ;;  %154 = vst.msk [vmem:[#allocation2] sm:$0xff] %vm153_vm0, %v518_v18  ;;  %s314_s4 = sshll.u32 %s519_s2, 4  ;;  %s315_s4 = int_to_ptr.vmem [resolvable:$true] %s314_s4 }
  0x19   :  { %v183_v6 = vsub.f32 %v179_v3, %v181_v4  ;;  %v182_v10 = vld [vmem:[#allocation7 + $0x8] sm:$0xff]  ;;  %v168_v13 = vld [vmem:[#allocation12 + $0x8] sm:$0xff]  ;;  %v243_v14 = vsub.f32 %v239_v7, %v241_v8  ;;  %155 = vst.msk [vmem:[#allocation2 + $0x8] sm:$0xff] %vm153_vm0, %v518_v18 }
  0x1a   :  { %v244_v11 = vmul.f32 %v242_v5, %v167_v0  ;;  %v184_v15 = vsub.f32 %v180_v9, %v182_v10  ;;  %157 = vst.msk [vmem:[#allocation3 + $0x8] sm:$0xff] %vm153_vm0, %v518_v18 }
  0x1b   :  { %v185_v12 = vmul.f32 %v183_v6, %v167_v0  ;;  %v245_v16 = vmul.f32 %v243_v14, %v168_v13 }
  0x1c   :  { %246 = vadd.xlane.f32.xlu2 %v244_v11  ;;  %v186_v17 = vmul.f32 %v184_v15, %v168_v13 }
  0x1d   :  { %187 = vadd.xlane.f32.xlu1 %v185_v12 }
  0x1e   :  { %v236_v55 = vld [vmem:[#allocation3] sm:$0xff] }
  0x1f   :  { %171 = vadd.xlane.f32.xlu0 %v168_v13  ;;  %v177_v56 = vld [vmem:[#allocation2] sm:$0xff] }
  0x20   :  { %v178_v8 = vld [vmem:[#allocation2 + $0x8] sm:$0xff] }
  0x21   :  { %v237_v7 = vld [vmem:[#allocation3 + $0x8] sm:$0xff] }
  0x24   :  { %248 = vadd.xlane.f32.xlu2 %v245_v16 }
  0x25   :  { %189 = vadd.xlane.f32.xlu1 %v186_v17 }
  0x8a   :  { %v170_v19 = vpop.xlane.xlu0 %169 }
  0x8b   :  { %v173_v20 = vmul.f32 0.0078125, %v170_v19 }
  0x8d   :  { %v175_v21 = vadd.f32 1e-06, %v173_v20 }
  0x8f   :  { %355 = vrcp.f32 %v175_v21  ;;  %v247_v23 = vpop.xlane.xlu2 %246  ;;  %v206_v32 = vand.u32 2147483648, %v175_v21  ;;  %v204_v34 = vand.u32 2147483647, %v175_v21  ;;  %vm200_vm2 = vweird.f32 %v175_v21 }
  0x90   :  { %v188_v25 = vpop.xlane.xlu1 %187  ;;  %v250_v30 = vmul.f32 0.0078125, %v247_v23 }
  0x91   :  { %v191_v31 = vmul.f32 0.0078125, %v188_v25  ;;  %v207_v40 = vor.u32 1.1754944e-38, %v206_v32  ;;  %vm205_vm4 = vcmp.eq.f32.partialorder %v204_v34, 8.507059e+37 }
  0x92   :  { %v172_v22 = vpop.xlane.xlu0 %171  ;;  %v252_v36 = vand.u32 2147483647, %v250_v30 }
  0x93   :  { %v174_v24 = vmul.f32 0.0078125, %v172_v22  ;;  %v193_v37 = vand.u32 2147483647, %v191_v31 }
  0x95   :  { %v356_v26 = vpop.eup %355  ;;  %v176_v27 = vadd.f32 1e-06, %v174_v24 }
  0x96   :  { %v196_v28 = vmul.f32 %v356_v26, %v175_v21  ;;  %vm201_vm1 = vweird.f32 %v356_v26 }
  0x97   :  { %357 = vrcp.f32 %v176_v27  ;;  %v249_v38 = vpop.xlane.xlu2 %248  ;;  %vm202_vm3 = vmor %vm200_vm2, %vm201_vm1  ;;  %v219_v50 = vand.u32 2147483647, %v176_v27  ;;  %v221_v51 = vand.u32 2147483648, %v176_v27  ;;  %vm215_vm6 = vweird.f32 %v176_v27 }
  0x98   :  { %v197_v29 = vsub.f32 1.0, %v196_v28  ;;  %v190_v41 = vpop.xlane.xlu1 %189  ;;  %v251_v45 = vmul.f32 0.0078125, %v249_v38 }
  0x99   :  { %v192_v49 = vmul.f32 0.0078125, %v190_v41  ;;  %v222_v62 = vor.u32 1.1754944e-38, %v221_v51  ;;  %vm220_vm8 = vcmp.eq.f32.partialorder %v219_v50, 8.507059e+37 }
  0x9a   :  { %v198_v33 = vmul.f32 %v356_v26, %v197_v29  ;;  %v253_v57 = vand.u32 2147483647, %v251_v45 }
  0x9b   :  { %v194_v61 = vand.u32 2147483647, %v192_v49 }
  0x9c   :  { %v199_v35 = vadd.f32 %v356_v26, %v198_v33 }
  0x9d   :  { %v358_v39 = vpop.eup %357 }
  0x9e   :  { %v211_v42 = vmul.f32 %v358_v39, %v176_v27  ;;  %v203_v43 = vsel %vm202_vm3, %v356_v26, %v199_v35  ;;  %vm216_vm5 = vweird.f32 %v358_v39 }
  0x9f   :  { %v208_v44 = vsel %vm205_vm4, %v207_v40, %v203_v43  ;;  %vm217_vm7 = vmor %vm215_vm6, %vm216_vm5 }
  0xa0   :  { %v254_v46 = vmul.f32 %v252_v36, %v208_v44  ;;  %v209_v47 = vmul.f32 %v208_v44, %v193_v37  ;;  %v212_v48 = vsub.f32 1.0, %v211_v42  ;;  %v158_v37 = vlaneseq }
  0xa2   :  { %v340_v52 = vadd.f32 -0.5, %v254_v46  ;;  %v338_v53 = vadd.f32 -0.5, %v209_v47  ;;  %v213_v54 = vmul.f32 %v358_v39, %v212_v48  ;;  %v159_v38 = vshrl.u32 %v158_v37, 7 }
  0xa4   :  { %v258_v58 = vmax.f32 %v340_v52, 0.0  ;;  %v227_v59 = vmax.f32 %v338_v53, 0.0  ;;  %v214_v60 = vadd.f32 %v358_v39, %v213_v54  ;;  %vm299_vm9 = vcmp.eq.s32.totalorder %v159_v38, 0 }
  0xa6   :  { %v262_v63 = vadd.f32 %v258_v58, %v236_v55  ;;  %v231_v0 = vadd.f32 %v227_v59, %v177_v56  ;;  %v218_v1 = vsel %vm217_vm7, %v358_v39, %v214_v60  ;;  %v298_v39 = vand.u32 127, %v158_v37 }
  0xa7   :  { %v223_v2 = vsel %vm220_vm8, %v222_v62, %v218_v1 }
  0xa8   :  { %264 = vst.msk [vmem:[#allocation3] sm:$0xff] %vm153_vm0, %v262_v63  ;;  %v255_v3 = vmul.f32 %v253_v57, %v223_v2  ;;  %v224_v4 = vmul.f32 %v223_v2, %v194_v61  ;;  %vm302_vm10 = vcmp.eq.s32.totalorder %v298_v39, 1  ;;  %vm300_vm11 = vcmp.eq.s32.totalorder %v298_v39, 0 }
  0xa9   :  { %234 = vst.msk [vmem:[#allocation2] sm:$0xff] %vm153_vm0, %v231_v0  ;;  %vm303_vm12 = vmand %vm299_vm9, %vm302_vm10 }
  0xaa   :  { %v341_v5 = vadd.f32 -0.5, %v255_v3  ;;  %v339_v6 = vadd.f32 -0.5, %v224_v4  ;;  %vm301_vm13 = vmand %vm299_vm9, %vm300_vm11 }
  0xac   :  { %v259_v9 = vmax.f32 %v341_v5, 0.0  ;;  %v228_v10 = vmax.f32 %v339_v6, 0.0 }
  0xae   :  { %v263_v11 = vadd.f32 %v259_v9, %v237_v7  ;;  %v232_v12 = vadd.f32 %v228_v10, %v178_v8 }
  0xaf   :  { %v283_v13 = vld [vmem:[#allocation3] sm:$0xff] }
  0xb0   :  { %265 = vst.msk [vmem:[#allocation3 + $0x8] sm:$0xff] %vm153_vm0, %v263_v11  ;;  %v269_v14 = vld [vmem:[#allocation2] sm:$0xff]  ;;  %v285_v16 = vsel %vm153_vm0, %v283_v13, 0.0 }
  0xb1   :  { %235 = vst.msk [vmem:[#allocation2 + $0x8] sm:$0xff] %vm153_vm0, %v232_v12  ;;  %v271_v20 = vsel %vm153_vm0, %v269_v14, 0.0 }
  0xb7   :  { %v284_v15 = vld [vmem:[#allocation3 + $0x8] sm:$0xff] }
  0xb8   :  { %v286_v17 = vsel %vm153_vm0, %v284_v15, 0.0  ;;  %v270_v18 = vld [vmem:[#allocation2 + $0x8] sm:$0xff] }
  0xb9   :  { %v287_v19 = vadd.f32 %v286_v17, %v285_v16  ;;  %v272_v21 = vsel %vm153_vm0, %v270_v18, 0.0 }
  0xba   :  { %v273_v22 = vadd.f32 %v272_v21, %v271_v20 }
  0xbb   :  { %288 = vadd.xlane.f32.xlu1 %v287_v19 }
  0xbc   :  { %274 = vadd.xlane.f32.xlu0 %v273_v22 }
 0x12e   :  { %v289_v23 = vpop.xlane.xlu1 %288 }
 0x12f   :  { %v290_v24 = vrot.slane %v289_v23, 4  ;;  %v275_v25 = vpop.xlane.xlu0 %274 }
 0x130   :  { %v276_v26 = vrot.slane %v275_v25, 4 }
 0x131   :  { %v291_v27 = vadd.f32 %v290_v24, %v289_v23 }
 0x132   :  { %v277_v28 = vadd.f32 %v276_v26, %v275_v25 }
 0x133   :  { %v292_v29 = vrot.slane %v291_v27, 2 }
 0x134   :  { %v278_v30 = vrot.slane %v277_v28, 2 }
 0x135   :  { %v293_v31 = vadd.f32 %v292_v29, %v291_v27 }
 0x136   :  { %v279_v32 = vadd.f32 %v278_v30, %v277_v28 }
 0x137   :  { %v294_v33 = vrot.slane %v293_v31, 1 }
 0x138   :  { %v280_v34 = vrot.slane %v279_v32, 1 }
 0x139   :  { %v295_v35 = vadd.f32 %v294_v33, %v293_v31 }
 0x13a   :  { %v281_v36 = vadd.f32 %v280_v34, %v279_v32 }
 0x13c   :  { %342 = vpush %v281_v36 }
 0x13d   :  { %344 = vpush %v295_v35 }
 0x16d   :  { %s343_s17 = spop %342 }
 0x16e   :  { %v306_v40 = vstv %s343_s17  ;;  %s345_s21 = spop %344 }
 0x16f   :  { %v304_v41 = vstv %s345_s21 }
 0x170   :  { %v305_v42 = vsel %vm303_vm12, %v304_v41, 0.0 }
 0x171   :  { %v307_v43 = vsel %vm301_vm13, %v306_v40, %v305_v42 }
 0x172   :  { %308 = vst [vmem:[#allocation13] sm:$0xff] %v307_v43 }
 0x173   :  { %319 = dma.vmem_to_hbm [thread:$0]  %s315_s4, 128, %s317_s20, [#allocation6]  }
 0x174   :  { %509 = dma.done.wait [#allocation6], 128  }
 0x175   :  { %510 = vsyncadd [#allocation6], 4294967168 }
 0x176   :  { %324 = vsyncpa [#allocation5], 1 }
 0x177   :  { %325 = vsyncpa [#allocation8], 1 }
 0x178   :  { %326 = vsyncpa [#allocation11], 1 }
 0x179   :  { %327 = vsyncpa [#allocation6], 1 }

</bundles_post_ra>
